<compile_context>
chip_gen: v7x
topology: tpu7x:2x2x1
jax: 0.10.0
libtpu: 0.0.40
codegen_flags: <defaults>
</compile_context>

<pallas_src>
import jax
import jax.numpy as jnp
from jax.experimental import pallas as pl
from jax.experimental.pallas import tpu as pltpu

_TBC = 128   # batch lanes per inner MXU pass (f32 one-hot chunk = 256*128*4 B = 128 KiB)
_TC = 256    # score rows per inner MXU pass (fills the 256-deep v6e/v7x MXU contraction)


def _ncf_score_kernel(ids_ref, s_ref, out_ref):
    # ids_ref: (2, TB) int32   -- row 0: user idx, row 1: item idx + num_users
    # s_ref:   (1, T_pad) f32  -- folded per-row scores [s_u + b | s_v | 0-pad], VMEM-resident
    # out_ref: (1, TB) f32     -- sigmoid scores, batch on the lane axis
    t_pad = s_ref.shape[1]
    tb = ids_ref.shape[1]
    tbc = min(_TBC, tb)
    tc = min(_TC, t_pad)
    n_bc = tb // tbc
    n_tc = t_pad // tc

    @pl.loop(0, n_bc)
    def _(bc):
        off = pl.multiple_of(bc * tbc, tbc)
        ids = ids_ref[:, pl.ds(off, tbc)]                  # (2, tbc)
        u = ids[0:1, :]                                    # (1, tbc)
        v = ids[1:2, :]                                    # (1, tbc), already offset by num_users
        acc = jnp.zeros((1, tbc), jnp.float32)
        for t in range(n_tc):                              # static unroll; n_tc is small
            rows = jax.lax.broadcasted_iota(jnp.int32, (tc, tbc), 0) + t * tc
            # Combined one-hot: row r hot for lane j iff r == u[j] or r == v[j];
            # one MXU pass then does both gathers AND the u+v add.
            onehot = ((rows == u) | (rows == v)).astype(jnp.float32)       # (tc, tbc)
            acc = acc + jnp.dot(s_ref[:, t * tc:(t + 1) * tc], onehot,
                                preferred_element_type=jnp.float32)
        out_ref[:, pl.ds(off, tbc)] = jax.nn.sigmoid(acc)  # unmasked lane-dense store


def ncf_fold_params(W, H, lin_w, lin_b):
    """One-time (per model, NOT per call) fold of the 1-unit linear head into the tables.

    Returns (s_all, row_off):
      s_all   (1, T_pad) f32 with s_all[0, u] = W[u] @ w[:k] + b and
              s_all[0, num_users + i] = H[i] @ w[k:]
      row_off (2, 1) int32 offsets [0, num_users] applied to raw [user, item] ids.
    """
    num_users, k = W.shape
    num_items = H.shape[0]
    wu = lin_w[0, :k].astype(jnp.float32)
    wv = lin_w[0, k:].astype(jnp.float32)
    s_u = W.astype(jnp.float32) @ wu + lin_b.astype(jnp.float32)[0]   # bias folded in
    s_v = H.astype(jnp.float32) @ wv
    T = num_users + num_items
    T_pad = int(pl.cdiv(T, _TC)) * _TC                                # multiple of 256
    s_all = jnp.pad(jnp.concatenate([s_u, s_v])[None, :], ((0, 0), (0, T_pad - T)))
    row_off = jnp.array([[0], [num_users]], jnp.int32)
    return s_all, row_off


def ncf_forward(x, s_all, row_off, *, max_batch_tile=2048):
    """Per-call path: x (N, 2) integer [user, item] pairs -> sigmoid scores (N,) f32."""
    N = x.shape[0]
    T_pad = s_all.shape[1]

    # Batch tile: lane-dense, multiple of 128, large enough to amortize grid-step overhead.
    TB = max(_TBC, min(int(max_batch_tile) // _TBC * _TBC, int(pl.cdiv(N, _TBC)) * _TBC))
    N_pad = int(pl.cdiv(N, TB)) * TB

    # Lane-dense (2, N_pad) index block: transpose + offset + pad (no scatter ops).
    ids = x.astype(jnp.int32).T + row_off
    ids = jnp.pad(ids, ((0, 0), (0, N_pad - N)))

    # VMEM budget: 2-buffered ids/out blocks + resident score row + one-hot temporaries.
    need = 2 * (2 * TB * 4 + TB * 4) + 2 * (T_pad * 4) + 4 * (_TC * _TBC * 4)
    try:
        cap = pltpu.get_tpu_info().vmem_capacity_bytes      # 128 MiB v5e/v6e, 64 MiB/TC v7x
    except Exception:
        cap = 64 * 1024 * 1024
    vmem_limit = int(min(3 * cap // 4, max(16 * 1024 * 1024, 8 * need)))

    out = pl.pallas_call(
        _ncf_score_kernel,
        out_shape=jax.ShapeDtypeStruct((1, N_pad), jnp.float32),
        grid=(N_pad // TB,),
        in_specs=[
            pl.BlockSpec((2, TB), lambda i: (0, i)),        # indices: tiled over batch
            # Folded score row: VMEM-resident across all grid steps.
            # NOTE(v7x): for huge catalogs add pipeline_mode=pl.Buffered(1) here so the
            # never-changing block is single- rather than double-buffered.
            pl.BlockSpec((1, T_pad), lambda i: (0, 0)),
        ],
        out_specs=pl.BlockSpec((1, TB), lambda i: (0, i)),  # lane-dense output slab
        compiler_params=pltpu.CompilerParams(
            dimension_semantics=("parallel",),              # v7x: shard batch tiles across TCs
            vmem_limit_bytes=vmem_limit,
        ),
    )(ids, s_all)
    return out[0, :N]                                       # matches torch .squeeze()


if __name__ == "__main__":
    num_users, num_items, embedding_k = 32, 48, 4
    batch = 8

    key = jax.random.PRNGKey(0)
    k1, k2, k3, k4, k5, k6 = jax.random.split(key, 6)

    # Deterministic synthetic parameters (shapes match the torch module).
    W = jax.random.normal(k1, (num_users, embedding_k), dtype=jnp.float32)       # Embedding W
    H = jax.random.normal(k2, (num_items, embedding_k), dtype=jnp.float32)       # Embedding H
    bound = 1.0 / float(jnp.sqrt(2.0 * embedding_k))
    lin_w = jax.random.uniform(k3, (1, 2 * embedding_k), minval=-bound, maxval=bound,
                               dtype=jnp.float32)                                # Linear weight
    lin_b = jax.random.uniform(k4, (1,), minval=-bound, maxval=bound,
                               dtype=jnp.float32)                                # Linear bias

    u_idx = jax.random.randint(k5, (batch,), 0, num_users, dtype=jnp.int32)
    i_idx = jax.random.randint(k6, (batch,), 0, num_items, dtype=jnp.int32)
    x = jnp.stack([u_idx, i_idx], axis=1)                                        # (batch, 2)

    # Hoisted one-time parameter fold ...
    s_all, row_off = jax.block_until_ready(ncf_fold_params(W, H, lin_w, lin_b))
    # ... then the jitted per-call path touches only the ids and the folded score row.
    ncf_apply = jax.jit(ncf_forward)
    out = jax.block_until_ready(ncf_apply(x, s_all, row_off))

    # Pure-JAX reference (mirrors the torch forward exactly, unfolded).
    z_emb = jnp.concatenate([W[x[:, 0]], H[x[:, 1]]], axis=1)                    # (batch, 2k)
    ref = jax.nn.sigmoid((z_emb @ lin_w.T + lin_b)[:, 0])                        # (batch,)

    assert out.shape == (batch,)
    assert out.dtype == jnp.float32
    # Head-fold reassociates the k-sum; compare with a small tolerance.
    assert jnp.allclose(out, ref, atol=1e-5, rtol=1e-5), (out, ref)
    print("KERNEL_OK")
</pallas_src>

<mosaic_0001>
module attributes {stable_mosaic.version = 11 : i64} {
  func.func @_ncf_score_kernel(%arg0: i32, %arg1: memref<2x128xi32, #tpu.memory_space<vmem>>, %arg2: memref<1x256xf32, #tpu.memory_space<vmem>>, %arg3: memref<1x128xf32, #tpu.memory_space<vmem>>) attributes {dimension_semantics = [#tpu.dimension_semantics<parallel>], iteration_bounds = array<i64: 1>, scalar_prefetch = 0 : i64, scratch_operands = 0 : i64, tpu.core_type = #tpu.core_type<tc>, window_params = [{transform_indices = @transform_0, window_bounds = array<i64: 2, 128>}, {pipeline_mode = #tpu.pipeline_mode<synchronous>, transform_indices = @transform_1, window_bounds = array<i64: 1, 256>}, {transform_indices = @transform_2, window_bounds = array<i64: 1, 128>}]} {
    %c0_i32 = arith.constant 0 : i32
    %c1_i32 = arith.constant 1 : i32
    %0 = arith.muli %c0_i32, %c1_i32 : i32
    %c0_i32_0 = arith.constant 0 : i32
    %1 = arith.addi %c0_i32_0, %0 : i32
    %c128_i32 = arith.constant 128 : i32
    %2 = arith.muli %1, %c128_i32 : i32
    %3 = tpu.assume_multiple %2, 128 : i32
    %c0 = arith.constant 0 : index
    %4 = arith.index_cast %3 : i32 to index
    %5 = vector.load %arg1[%c0, %4] : memref<2x128xi32, #tpu.memory_space<vmem>>, vector<2x128xi32>
    %6 = vector.extract_strided_slice %5 {offsets = [0, 0], sizes = [1, 128], strides = [1, 1]} : vector<2x128xi32> to vector<1x128xi32>
    %7 = vector.extract_strided_slice %5 {offsets = [1, 0], sizes = [1, 128], strides = [1, 1]} : vector<2x128xi32> to vector<1x128xi32>
    %cst = arith.constant 0.000000e+00 : f32
    %8 = vector.broadcast %cst : f32 to vector<1x128xf32>
    %9 = tpu.iota {dimensions = array<i32: 0>} : vector<256x128xi32>
    %c0_i32_1 = arith.constant 0 : i32
    %10 = vector.broadcast %c0_i32_1 : i32 to vector<256x128xi32>
    %11 = arith.addi %9, %10 : vector<256x128xi32>
    %12 = vector.broadcast %6 : vector<1x128xi32> to vector<256x128xi32>
    %13 = arith.cmpi eq, %11, %12 : vector<256x128xi32>
    %14 = vector.broadcast %7 : vector<1x128xi32> to vector<256x128xi32>
    %15 = arith.cmpi eq, %11, %14 : vector<256x128xi32>
    %16 = arith.ori %13, %15 : vector<256x128xi1>
    %17 = arith.extui %16 : vector<256x128xi1> to vector<256x128xi32>
    %18 = arith.sitofp %17 : vector<256x128xi32> to vector<256x128xf32>
    %c0_2 = arith.constant 0 : index
    %c0_3 = arith.constant 0 : index
    %19 = vector.load %arg2[%c0_2, %c0_3] : memref<1x256xf32, #tpu.memory_space<vmem>>, vector<1x256xf32>
    %cst_4 = arith.constant dense<0.000000e+00> : vector<1x128xf32>
    %20 = tpu.matmul %19, %18, %cst_4 {dimension_numbers = #tpu.dot_dimension_numbers<[1], [0], [0], [1], [0, 0, 1, 1], [], []>} : vector<1x256xf32>, vector<256x128xf32>, vector<1x128xf32> -> vector<1x128xf32>
    %21 = arith.addf %8, %20 : vector<1x128xf32>
    %22 = arith.negf %21 : vector<1x128xf32>
    %23 = math.exp %22 : vector<1x128xf32>
    %cst_5 = arith.constant 1.000000e+00 : f32
    %24 = vector.broadcast %cst_5 : f32 to vector<1x128xf32>
    %25 = arith.addf %24, %23 : vector<1x128xf32>
    %26 = arith.divf %24, %25 : vector<1x128xf32>
    %c0_6 = arith.constant 0 : index
    %27 = arith.index_cast %3 : i32 to index
    %28 = vector.load %arg3[%c0_6, %27] : memref<1x128xf32, #tpu.memory_space<vmem>>, vector<1x128xf32>
    tpu.vector_store %arg3[%c0_6, %27], %26 {strides = array<i32>} : memref<1x128xf32, #tpu.memory_space<vmem>>, vector<1x128xf32>,
    %c1_i32_7 = arith.constant 1 : i32
    return
  }
  func.func @transform_0(%arg0: i32) -> (i32, i32) {
    %c0_i32 = arith.constant 0 : i32
    %c0_i32_0 = arith.constant 0 : i32
    return %c0_i32, %arg0 : i32, i32
  }
  func.func @transform_1(%arg0: i32) -> (i32, i32) {
    %c0_i32 = arith.constant 0 : i32
    %c0_i32_0 = arith.constant 0 : i32
    %c0_i32_1 = arith.constant 0 : i32
    return %c0_i32, %c0_i32_0 : i32, i32
  }
  func.func @transform_2(%arg0: i32) -> (i32, i32) {
    %c0_i32 = arith.constant 0 : i32
    %c0_i32_0 = arith.constant 0 : i32
    return %c0_i32, %arg0 : i32, i32
  }
}

</mosaic_0001>

<bundles_post_ra>
// kernel: ncf_forward.1
= control target key start
LH: loop header
LB: loop body
LE: loop exit
PB: predicated region body
PF: predicated region fallthrough
CT: control target
= control target key end

     0   :  { %v12_v0 = vlaneseq  ;;  %v443_v13 = vmov 1.0|1.0   ;;  %s601_s0 = inlined_call_operand.vmem [shape: s32[2,128], index: 0, kind: input, shape index: {}]   ;;  %s602_s1 = inlined_call_operand.vmem [shape: f32[1,256], index: 1, kind: input, shape index: {}]   ;;  %s603_s2 = inlined_call_operand.vmem [shape: f32[1,128], index: 2, kind: output, shape index: {}]  }
   0x1   :  { %v11_v2 = vld [vmem:[%s601_s0] sm:$0x3] }
   0x2   :  { %v459_v1 = vshrl.u32 %v12_v0, 7  ;;  %v527_v23 = vld [vmem:[%s602_s1] sm:$0x3] }
   0x4   :  { %v29_v3 = vadd.s32 128, %v459_v1  ;;  %v30_v4 = vadd.s32 136, %v459_v1  ;;  %v47_v5 = vsub.s32 0, %v459_v1  ;;  %v83_v6 = vsub.s32 1, %v459_v1 }
   0x5   :  { %v14_v9 = vadd.s32 8, %v459_v1  ;;  %v31_v10 = vadd.s32 144, %v459_v1  ;;  %v32_v11 = vadd.s32 152, %v459_v1  ;;  %v15_v12 = vadd.s32 16, %v459_v1 }
   0x6   :  { %v470_v7 = vrot.slane %v11_v2, %v47_v5  ;;  %v474_v8 = vrot.slane %v11_v2, %v83_v6  ;;  %v16_v14 = vadd.s32 24, %v459_v1  ;;  %v33_v15 = vadd.s32 160, %v459_v1 }
   0x7   :  { %v34_v16 = vadd.s32 168, %v459_v1  ;;  %v17_v17 = vadd.s32 32, %v459_v1  ;;  %v18_v18 = vadd.s32 40, %v459_v1  ;;  %v35_v19 = vadd.s32 176, %v459_v1 }
   0x8   :  { %vm65_vm0 = vcmp.eq.s32.totalorder %v29_v3, %v470_v7  ;;  %vm66_vm1 = vcmp.eq.s32.totalorder %v30_v4, %v470_v7  ;;  %vm101_vm2 = vcmp.eq.s32.totalorder %v29_v3, %v474_v8  ;;  %vm102_vm3 = vcmp.eq.s32.totalorder %v30_v4, %v474_v8 }
   0x9   :  { %vm133_vm4 = vmor %vm65_vm0, %vm101_vm2  ;;  %vm49_vm5 = vcmp.eq.s32.totalorder %v459_v1, %v470_v7  ;;  %vm85_vm6 = vcmp.eq.s32.totalorder %v459_v1, %v474_v8  ;;  %vm50_vm8 = vcmp.eq.s32.totalorder %v14_v9, %v470_v7  ;;  %vm86_vm9 = vcmp.eq.s32.totalorder %v14_v9, %v474_v8 }
   0xa   :  { %vm134_vm7 = vmor %vm66_vm1, %vm102_vm3  ;;  %vm67_vm12 = vcmp.eq.s32.totalorder %v31_v10, %v470_v7  ;;  %vm103_vm13 = vcmp.eq.s32.totalorder %v31_v10, %v474_v8  ;;  %vm68_vm15 = vcmp.eq.s32.totalorder %v32_v11, %v470_v7  ;;  %vm104_vm0 = vcmp.eq.s32.totalorder %v32_v11, %v474_v8 }
   0xb   :  { %vm406_vm10 = vmpackc.low %vm134_vm7, %vm133_vm4  ;;  %vm51_vm3 = vcmp.eq.s32.totalorder %v15_v12, %v470_v7  ;;  %vm87_vm4 = vcmp.eq.s32.totalorder %v15_v12, %v474_v8  ;;  %vm88_vm7 = vcmp.eq.s32.totalorder %v16_v14, %v474_v8  ;;  %v36_v20 = vadd.s32 184, %v459_v1 }
   0xc   :  { %407 = vmatprep.subr.msk.bf16.mxu0 %vm406_vm10, %v443_v13  ;;  %vm117_vm11 = vmor %vm49_vm5, %vm85_vm6  ;;  %vm52_vm6 = vcmp.eq.s32.totalorder %v16_v14, %v470_v7  ;;  %vm69_vm10 = vcmp.eq.s32.totalorder %v33_v15, %v470_v7  ;;  %v19_v21 = vadd.s32 48, %v459_v1  ;;  %v20_v22 = vadd.s32 56, %v459_v1 }
   0xd   :  { %vm118_vm14 = vmor %vm50_vm8, %vm86_vm9  ;;  %v37_v24 = vadd.s32 192, %v459_v1  ;;  %v38_v25 = vadd.s32 200, %v459_v1  ;;  %v222_v26 = vrot.slane %v527_v23, %v83_v6  ;;  %v21_v27 = vadd.s32 64, %v459_v1 }
   0xe   :  { %vm408_vm1 = vmpackc.low %vm118_vm14, %vm117_vm11  ;;  %vm105_vm11 = vcmp.eq.s32.totalorder %v33_v15, %v474_v8  ;;  %vm106_vm14 = vcmp.eq.s32.totalorder %v34_v16, %v474_v8  ;;  %v22_v28 = vadd.s32 72, %v459_v1  ;;  %v39_v29 = vadd.s32 208, %v459_v1 }
   0xf   :  { %409 = vmatpush3.bf16.msk.msra.mxu0 %vm408_vm1, %v443_v13  ;;  %vm135_vm2 = vmor %vm67_vm12, %vm103_vm13  ;;  %vm70_vm13 = vcmp.eq.s32.totalorder %v34_v16, %v470_v7  ;;  %vm53_vm1 = vcmp.eq.s32.totalorder %v17_v17, %v470_v7  ;;  %289 = vmatprep.mubr.f32.mxu0 %v222_v26  ;;  %v40_v30 = vadd.s32 216, %v459_v1  ;;  %v23_v31 = vadd.s32 80, %v459_v1 }
  0x10   :  { %vm136_vm5 = vmor %vm68_vm15, %vm104_vm0  ;;  %v24_v32 = vadd.s32 88, %v459_v1  ;;  %v41_v33 = vadd.s32 224, %v459_v1  ;;  %v42_v34 = vadd.s32 232, %v459_v1  ;;  %v25_v35 = vadd.s32 96, %v459_v1 }
  0x11   :  { %vm410_vm8 = vmpackc.low %vm136_vm5, %vm135_vm2  ;;  %vm89_vm2 = vcmp.eq.s32.totalorder %v17_v17, %v474_v8  ;;  %vm90_vm5 = vcmp.eq.s32.totalorder %v18_v18, %v474_v8  ;;  %v26_v36 = vadd.s32 104, %v459_v1  ;;  %v43_v37 = vadd.s32 240, %v459_v1 }
  0x12   :  { %411 = vmatprep.subr.msk.bf16.mxu0 %vm410_vm8, %v443_v13  ;;  %vm119_vm9 = vmor %vm51_vm3, %vm87_vm4  ;;  %vm54_vm4 = vcmp.eq.s32.totalorder %v18_v18, %v470_v7  ;;  %vm71_vm8 = vcmp.eq.s32.totalorder %v35_v19, %v470_v7  ;;  %v44_v38 = vadd.s32 248, %v459_v1  ;;  %v27_v39 = vadd.s32 112, %v459_v1 }
  0x13   :  { %vm120_vm12 = vmor %vm52_vm6, %vm88_vm7  ;;  %v28_v40 = vadd.s32 120, %v459_v1  ;;  %v218_v41 = vrot.slane %v527_v23, %v47_v5 }
  0x14   :  { %vm412_vm15 = vmpackc.low %vm120_vm12, %vm119_vm9  ;;  %vm107_vm9 = vcmp.eq.s32.totalorder %v35_v19, %v474_v8  ;;  %vm108_vm12 = vcmp.eq.s32.totalorder %v36_v20, %v474_v8 }
  0x15   :  { %413 = vmatpush3.bf16.msk.msra.mxu0 %vm412_vm15, %v443_v13  ;;  %vm137_vm0 = vmor %vm69_vm10, %vm105_vm11  ;;  %vm72_vm11 = vcmp.eq.s32.totalorder %v36_v20, %v470_v7  ;;  %vm55_vm15 = vcmp.eq.s32.totalorder %v19_v21, %v470_v7 }
  0x16   :  { %vm138_vm3 = vmor %vm70_vm13, %vm106_vm14 }
  0x17   :  { %vm414_vm6 = vmpackc.low %vm138_vm3, %vm137_vm0  ;;  %vm91_vm0 = vcmp.eq.s32.totalorder %v19_v21, %v474_v8  ;;  %vm92_vm3 = vcmp.eq.s32.totalorder %v20_v22, %v474_v8 }
  0x18   :  { %415 = vmatprep.subr.msk.bf16.mxu0 %vm414_vm6, %v443_v13  ;;  %vm121_vm7 = vmor %vm53_vm1, %vm89_vm2  ;;  %vm56_vm2 = vcmp.eq.s32.totalorder %v20_v22, %v470_v7  ;;  %vm73_vm6 = vcmp.eq.s32.totalorder %v37_v24, %v470_v7 }
  0x19   :  { %vm122_vm10 = vmor %vm54_vm4, %vm90_vm5 }
  0x1a   :  { %vm416_vm13 = vmpackc.low %vm122_vm10, %vm121_vm7  ;;  %vm109_vm7 = vcmp.eq.s32.totalorder %v37_v24, %v474_v8  ;;  %vm110_vm10 = vcmp.eq.s32.totalorder %v38_v25, %v474_v8 }
  0x1b   :  { %417 = vmatpush3.bf16.msk.msra.mxu0 %vm416_vm13, %v443_v13  ;;  %vm139_vm14 = vmor %vm71_vm8, %vm107_vm9  ;;  %vm74_vm9 = vcmp.eq.s32.totalorder %v38_v25, %v470_v7  ;;  %vm57_vm13 = vcmp.eq.s32.totalorder %v21_v27, %v470_v7 }
  0x1c   :  { %vm140_vm1 = vmor %vm72_vm11, %vm108_vm12 }
  0x1d   :  { %vm418_vm4 = vmpackc.low %vm140_vm1, %vm139_vm14  ;;  %vm93_vm14 = vcmp.eq.s32.totalorder %v21_v27, %v474_v8  ;;  %vm94_vm1 = vcmp.eq.s32.totalorder %v22_v28, %v474_v8 }
  0x1e   :  { %419 = vmatprep.subr.msk.bf16.mxu0 %vm418_vm4, %v443_v13  ;;  %vm123_vm5 = vmor %vm55_vm15, %vm91_vm0  ;;  %vm58_vm0 = vcmp.eq.s32.totalorder %v22_v28, %v470_v7  ;;  %vm75_vm4 = vcmp.eq.s32.totalorder %v39_v29, %v470_v7 }
  0x1f   :  { %vm124_vm8 = vmor %vm56_vm2, %vm92_vm3 }
  0x20   :  { %vm420_vm11 = vmpackc.low %vm124_vm8, %vm123_vm5  ;;  %vm111_vm5 = vcmp.eq.s32.totalorder %v39_v29, %v474_v8  ;;  %vm112_vm8 = vcmp.eq.s32.totalorder %v40_v30, %v474_v8 }
  0x21   :  { %421 = vmatpush3.bf16.msk.msra.mxu0 %vm420_vm11, %v443_v13  ;;  %vm141_vm12 = vmor %vm73_vm6, %vm109_vm7  ;;  %vm76_vm7 = vcmp.eq.s32.totalorder %v40_v30, %v470_v7  ;;  %vm59_vm11 = vcmp.eq.s32.totalorder %v23_v31, %v470_v7 }
  0x22   :  { %vm142_vm15 = vmor %vm74_vm9, %vm110_vm10 }
  0x23   :  { %vm422_vm2 = vmpackc.low %vm142_vm15, %vm141_vm12  ;;  %vm95_vm12 = vcmp.eq.s32.totalorder %v23_v31, %v474_v8  ;;  %vm96_vm15 = vcmp.eq.s32.totalorder %v24_v32, %v474_v8 }
  0x24   :  { %423 = vmatprep.subr.msk.bf16.mxu0 %vm422_vm2, %v443_v13  ;;  %vm125_vm3 = vmor %vm57_vm13, %vm93_vm14  ;;  %vm60_vm14 = vcmp.eq.s32.totalorder %v24_v32, %v470_v7  ;;  %vm77_vm2 = vcmp.eq.s32.totalorder %v41_v33, %v470_v7 }
  0x25   :  { %vm126_vm6 = vmor %vm58_vm0, %vm94_vm1 }
  0x26   :  { %vm424_vm9 = vmpackc.low %vm126_vm6, %vm125_vm3  ;;  %vm113_vm3 = vcmp.eq.s32.totalorder %v41_v33, %v474_v8  ;;  %vm114_vm6 = vcmp.eq.s32.totalorder %v42_v34, %v474_v8 }
  0x27   :  { %425 = vmatpush3.bf16.msk.msra.mxu0 %vm424_vm9, %v443_v13  ;;  %vm143_vm10 = vmor %vm75_vm4, %vm111_vm5  ;;  %vm78_vm5 = vcmp.eq.s32.totalorder %v42_v34, %v470_v7  ;;  %vm61_vm9 = vcmp.eq.s32.totalorder %v25_v35, %v470_v7 }
  0x28   :  { %vm144_vm13 = vmor %vm76_vm7, %vm112_vm8 }
  0x29   :  { %vm426_vm0 = vmpackc.low %vm144_vm13, %vm143_vm10  ;;  %vm97_vm10 = vcmp.eq.s32.totalorder %v25_v35, %v474_v8  ;;  %vm98_vm13 = vcmp.eq.s32.totalorder %v26_v36, %v474_v8 }
  0x2a   :  { %427 = vmatprep.subr.msk.bf16.mxu0 %vm426_vm0, %v443_v13  ;;  %vm127_vm1 = vmor %vm59_vm11, %vm95_vm12  ;;  %vm62_vm12 = vcmp.eq.s32.totalorder %v26_v36, %v470_v7  ;;  %vm79_vm0 = vcmp.eq.s32.totalorder %v43_v37, %v470_v7 }
  0x2b   :  { %vm128_vm4 = vmor %vm60_vm14, %vm96_vm15 }
  0x2c   :  { %vm428_vm7 = vmpackc.low %vm128_vm4, %vm127_vm1  ;;  %vm115_vm1 = vcmp.eq.s32.totalorder %v43_v37, %v474_v8  ;;  %vm116_vm4 = vcmp.eq.s32.totalorder %v44_v38, %v474_v8 }
  0x2d   :  { %429 = vmatpush3.bf16.msk.msra.mxu0 %vm428_vm7, %v443_v13  ;;  %vm145_vm8 = vmor %vm77_vm2, %vm113_vm3  ;;  %vm80_vm3 = vcmp.eq.s32.totalorder %v44_v38, %v470_v7  ;;  %vm63_vm7 = vcmp.eq.s32.totalorder %v27_v39, %v470_v7 }
  0x2e   :  { %vm146_vm11 = vmor %vm78_vm5, %vm114_vm6 }
  0x2f   :  { %vm430_vm14 = vmpackc.low %vm146_vm11, %vm145_vm8  ;;  %vm99_vm8 = vcmp.eq.s32.totalorder %v27_v39, %v474_v8  ;;  %vm100_vm11 = vcmp.eq.s32.totalorder %v28_v40, %v474_v8 }
  0x30   :  { %431 = vmatprep.subr.msk.bf16.mxu0 %vm430_vm14, %v443_v13  ;;  %vm129_vm15 = vmor %vm61_vm9, %vm97_vm10  ;;  %vm64_vm10 = vcmp.eq.s32.totalorder %v28_v40, %v470_v7 }
  0x31   :  { %vm130_vm2 = vmor %vm62_vm12, %vm98_vm13 }
  0x32   :  { %vm432_vm5 = vmpackc.low %vm130_vm2, %vm129_vm15 }
  0x33   :  { %433 = vmatpush3.bf16.msk.msra.mxu0 %vm432_vm5, %v443_v13  ;;  %vm147_vm6 = vmor %vm79_vm0, %vm115_vm1 }
  0x34   :  { %vm148_vm9 = vmor %vm80_vm3, %vm116_vm4 }
  0x35   :  { %vm434_vm14 = vmpackc.low %vm148_vm9, %vm147_vm6 }
  0x36   :  { %435 = vmatprep.subr.msk.bf16.mxu0 %vm434_vm14, %v443_v13  ;;  %vm131_vm12 = vmor %vm63_vm7, %vm99_vm8 }
  0x37   :  { %vm132_vm13 = vmor %vm64_vm10, %vm100_vm11 }
  0x38   :  { %vm436_vm2 = vmpackc.low %vm132_vm13, %vm131_vm12 }
  0x39   :  { %437 = vmatpush3.bf16.msk.msra.mxu0 %vm436_vm2, %v443_v13 }
  0x3c   :  { %290 = vmatmul.mubr.f32.vlgmr.msra.gmra.mrb[0].mxu0 %v218_v41 }
 0x10f   :  { %v403_v42 = vpop.f32.mrb[0].mxu0 }
 0x110   :  { %v404_v43 = vpop.f32.mrb[1].mxu0 }
 0x111   :  { %v405_v44 = vadd.f32 %v404_v43, %v403_v42 }
 0x113   :  { %v370_v45 = vmul.f32 -1.442695, %v405_v44 }
 0x115   :  { %439 = vpow2.f32 %v370_v45 }
 0x11f   :  { %v440_v46 = vpop.eup %439 }
 0x120   :  { %v298_v47 = vadd.f32 1.0, %v440_v46 }
 0x122   :  { %441 = vrcp.f32 %v298_v47 }
 0x12c   :  { %v442_v48 = vpop.eup %441 }
 0x12d   :  { %301 = vst [vmem:[%s603_s2] sm:$0x1] %v442_v48 }

</bundles_post_ra>
